<compile_context>
chip_gen: v7x
topology: tpu7x:2x2x1
jax: 0.10.0
libtpu: 0.0.40
codegen_flags: <defaults>
</compile_context>

<pallas_src>
import jax
import jax.numpy as jnp
from jax.experimental import pallas as pl
from jax.experimental.pallas import tpu as pltpu


def _round_up(n, m):
    return ((n + m - 1) // m) * m


def _vmem_limit(working_set_bytes):
    # 2x headroom + slack, floored (compiler-internal scratch) and capped; actual
    # usage is kept bounded by Buffered(1) weights and the K-split path.
    return int(min(96 << 20, max(8 << 20, 2 * working_set_bytes + (2 << 20))))


# --------------------------------------------------------------------------- kernels
def _affinity_mlp_kernel(x_ref, w1_ref, b1_ref, w2_ref, b2_ref, o_ref):
    # x: (TB, H) native dtype   w1: (H, Hp) bf16, VMEM-resident   b1/w2: (1, Hp) f32
    # b2: (1,) f32 SMEM scalar  o: (1, TB) f32 lane-dense output slab row
    x = x_ref[...].astype(w1_ref.dtype)           # vreg-level cast, no extra HBM pass
    h = jnp.dot(x, w1_ref[...], preferred_element_type=jnp.float32)
    h = h + b1_ref[...]
    h = jnp.maximum(h, 0.01 * h)                  # LeakyReLU (slope 0.01), single vmax
    # Linear(H -> 1): VPU multiply + cross-lane sum instead of an N=1 MXU matmul.
    y = jnp.sum(h * w2_ref[...], axis=-1) + b2_ref[0]
    o_ref[...] = jnp.reshape(y, (1, y.shape[0])).astype(o_ref.dtype)


def _affinity_mlp_kernel_ksplit(x_ref, w1_ref, b1_ref, w2_ref, b2_ref, o_ref, acc_ref):
    # Streams w1 in (TK, Hp) panels along grid axis 1; f32 accumulator in VMEM.
    k = pl.program_id(1)

    @pl.when(k == 0)
    def _():
        acc_ref[...] = jnp.zeros_like(acc_ref)

    x = x_ref[...].astype(w1_ref.dtype)
    acc_ref[...] += jnp.dot(x, w1_ref[...], preferred_element_type=jnp.float32)

    @pl.when(k == pl.num_programs(1) - 1)
    def _():
        h = acc_ref[...] + b1_ref[...]
        h = jnp.maximum(h, 0.01 * h)
        y = jnp.sum(h * w2_ref[...], axis=-1) + b2_ref[0]
        o_ref[...] = jnp.reshape(y, (1, y.shape[0])).astype(o_ref.dtype)


# --------------------------------------------------------------------------- wrapper
def affinity_mlp(x, w1, b1, w2, b2, *, max_tile=1024, ksplit_w1_bytes=32 << 20):
    """x: (B, 1, H) or (B, H) in its native float dtype.
    w1: (H, Hp) pre-transposed / pre-padded bf16; b1, w2: (1, Hp) f32; b2: (1,) f32
    (see prepare_params).  Returns (B, 1) float32."""
    if x.ndim == 3:
        x = jnp.squeeze(x, axis=1)                # (B, H)
    B, H = x.shape
    Hin, Hp = w1.shape
    assert Hin == H, f"w1 contraction dim {Hin} != activation width {H}"

    # ---- batch tiling: no jnp.pad copy; Pallas pads the ragged last tile ----
    if B <= 128:
        TB = B                                    # single tile, block == full array
    else:
        # >= 2 tiles (keeps v7x's 2nd TensorCore busy), 128-aligned, <= max_tile rows
        TB = max(128, min(max_tile, _round_up(pl.cdiv(B, 2), 128)))
    num_tiles = pl.cdiv(B, TB)

    w1_bytes = w1.size * w1.dtype.itemsize
    param_bytes = (b1.size + w2.size) * 4
    x_tile_bytes = TB * H * x.dtype.itemsize

    # ---- large-H: split the contraction dim so weight panels fit v7x's 64 MiB ----
    tk = None
    if w1_bytes > ksplit_w1_bytes:
        for cand in (2048, 1024, 512, 256, 128):
            if H % cand == 0:
                tk = cand
                break
        # TODO(synk): a ragged contraction dim (H not a multiple of 128) would need an
        #             explicit zero-padded K tail; fall back to the resident-w1 path.

    cost = pl.CostEstimate(
        flops=2 * B * H * Hp + 2 * B * Hp,
        transcendentals=0,
        bytes_accessed=B * H * x.dtype.itemsize + w1_bytes + param_bytes + B * 4,
    )

    if tk is None:
        vmem_bytes = (w1_bytes + param_bytes      # resident params (Buffered(1))
                      + 2 * x_tile_bytes          # double-buffered x tile
                      + 2 * TB * 4                # double-buffered out row
                      + TB * Hp * 4)              # f32 intermediate headroom
        out = pl.pallas_call(
            _affinity_mlp_kernel,
            out_shape=jax.ShapeDtypeStruct((num_tiles, TB), jnp.float32),
            grid=(num_tiles,),
            in_specs=[
                pl.BlockSpec((TB, H), lambda i: (i, 0)),                 # x, streamed
                pl.BlockSpec((H, Hp), lambda i: (0, 0),
                             pipeline_mode=pl.Buffered(1)),              # w1, resident
                pl.BlockSpec((1, Hp), lambda i: (0, 0),
                             pipeline_mode=pl.Buffered(1)),              # b1, resident
                pl.BlockSpec((1, Hp), lambda i: (0, 0),
                             pipeline_mode=pl.Buffered(1)),              # w2, resident
                pl.BlockSpec(memory_space=pltpu.MemorySpace.SMEM),       # b2 scalar
            ],
            out_specs=pl.BlockSpec((1, TB), lambda i: (i, 0)),           # lane-dense slab
            compiler_params=pltpu.CompilerParams(
                dimension_semantics=("parallel",),
                vmem_limit_bytes=_vmem_limit(vmem_bytes),
            ),
            cost_estimate=cost,
        )(x, w1, b1, w2, b2)
    else:
        num_k = H // tk
        vmem_bytes = (2 * tk * Hp * w1.dtype.itemsize    # double-buffered w1 panel
                      + param_bytes
                      + 2 * TB * tk * x.dtype.itemsize   # double-buffered x panel
                      + TB * Hp * 4                      # f32 accumulator
                      + 2 * TB * 4)
        out = pl.pallas_call(
            _affinity_mlp_kernel_ksplit,
            out_shape=jax.ShapeDtypeStruct((num_tiles, TB), jnp.float32),
            grid=(num_tiles, num_k),
            in_specs=[
                pl.BlockSpec((TB, tk), lambda i, k: (i, k)),             # x panel
                pl.BlockSpec((tk, Hp), lambda i, k: (k, 0)),             # w1 panel, streamed
                pl.BlockSpec((1, Hp), lambda i, k: (0, 0),
                             pipeline_mode=pl.Buffered(1)),              # b1, resident
                pl.BlockSpec((1, Hp), lambda i, k: (0, 0),
                             pipeline_mode=pl.Buffered(1)),              # w2, resident
                pl.BlockSpec(memory_space=pltpu.MemorySpace.SMEM),       # b2 scalar
            ],
            out_specs=pl.BlockSpec((1, TB), lambda i, k: (i, 0)),
            scratch_shapes=[pltpu.VMEM((TB, Hp), jnp.float32)],
            compiler_params=pltpu.CompilerParams(
                dimension_semantics=("parallel", "arbitrary"),
                vmem_limit_bytes=_vmem_limit(vmem_bytes),
            ),
            cost_estimate=cost,
        )(x, w1, b1, w2, b2)

    # (num_tiles, TB) row-major == batch order; drop the ragged tail, restore (B, 1).
    return out.reshape(num_tiles * TB, 1)[:B]


# ------------------------------------------------------------------- params / reference
def init_params(key, h):
    """Synthetic f32 parameters in PyTorch nn.Linear layout:
    W1: (h, h) [out, in], b1: (h,), W2: (1, h), b2: (1,)."""
    k1, k2, k3, k4 = jax.random.split(key, 4)
    s = 1.0 / jnp.sqrt(h)
    W1 = jax.random.uniform(k1, (h, h), jnp.float32, -s, s)
    b1 = jax.random.uniform(k2, (h,), jnp.float32, -s, s)
    W2 = jax.random.uniform(k3, (1, h), jnp.float32, -s, s)
    b2 = jax.random.uniform(k4, (1,), jnp.float32, -s, s)
    return W1, b1, W2, b2


def prepare_params(W1, b1, W2, b2, *, weight_dtype=jnp.bfloat16, lane_multiple=128):
    """One-time preprocessing (done at parameter-load time, NOT per forward call):
    transpose W1 to (in, out), cast the big weight to bf16 once, and zero-pad the
    hidden *output* dim to a 128-lane multiple (zero columns are numerically inert:
    bias 0 -> LeakyReLU(0)=0 -> w2 0)."""
    H_out, _ = W1.shape
    Hp = _round_up(H_out, lane_multiple)
    pad = Hp - H_out
    w1 = jnp.pad(W1.T.astype(weight_dtype), ((0, 0), (0, pad)))      # (H_in, Hp) bf16
    b1p = jnp.pad(b1.astype(jnp.float32), (0, pad)).reshape(1, Hp)   # (1, Hp)
    w2p = jnp.pad(W2.astype(jnp.float32), ((0, 0), (0, pad)))        # (1, Hp)
    return w1, b1p, w2p, b2.astype(jnp.float32)


def reference(x, W1, b1, W2, b2):
    if x.ndim == 3:
        x = jnp.squeeze(x, axis=1)
    h = x @ W1.T + b1[None, :]
    h = jnp.where(h > 0, h, 0.01 * h)
    return h @ W2.T + b2[None, :]


if __name__ == "__main__":
    B, H = 8, 32
    key = jax.random.PRNGKey(0)
    kx, kp = jax.random.split(key)
    # binding_complex: batch x 1 x H
    x = jax.random.normal(kx, (B, 1, H), dtype=jnp.float32)
    W1, b1, W2, b2 = init_params(kp, H)
    w1_p, b1_p, w2_p, b2_p = prepare_params(W1, b1, W2, b2)   # one-time, at load

    y = affinity_mlp(x, w1_p, b1_p, w2_p, b2_p)
    jax.block_until_ready(y)

    y_ref = reference(x, W1, b1, W2, b2)
    assert y.shape == (B, 1)
    # bf16 weight (and in-kernel bf16 activation cast) -> loosened tolerance vs f32 ref.
    assert jnp.allclose(y, y_ref, atol=2e-2, rtol=2e-2), float(jnp.max(jnp.abs(y - y_ref)))

    print("KERNEL_OK")
</pallas_src>

<mosaic_0001>
module attributes {stable_mosaic.version = 11 : i64} {
  func.func @_affinity_mlp_kernel(%arg0: i32, %arg1: memref<8x32xf32, #tpu.memory_space<vmem>>, %arg2: memref<32x128xbf16, #tpu.memory_space<vmem>>, %arg3: memref<1x128xf32, #tpu.memory_space<vmem>>, %arg4: memref<1x128xf32, #tpu.memory_space<vmem>>, %arg5: memref<1xf32, #tpu.memory_space<smem>>, %arg6: memref<1x8xf32, #tpu.memory_space<vmem>>) attributes {dimension_semantics = [#tpu.dimension_semantics<parallel>], iteration_bounds = array<i64: 1>, scalar_prefetch = 0 : i64, scratch_operands = 0 : i64, tpu.core_type = #tpu.core_type<tc>, window_params = [{transform_indices = @transform_0, window_bounds = array<i64: 8, 32>}, {pipeline_mode = #tpu.pipeline_mode<synchronous>, transform_indices = @transform_1, window_bounds = array<i64: 32, 128>}, {pipeline_mode = #tpu.pipeline_mode<synchronous>, transform_indices = @transform_2, window_bounds = array<i64: 1, 128>}, {pipeline_mode = #tpu.pipeline_mode<synchronous>, transform_indices = @transform_3, window_bounds = array<i64: 1, 128>}, {transform_indices = @transform_4, window_bounds = array<i64: 1>}, {transform_indices = @transform_5, window_bounds = array<i64: 1, 8>}]} {
    %c0 = arith.constant 0 : index
    %c0_0 = arith.constant 0 : index
    %0 = vector.load %arg1[%c0, %c0_0] : memref<8x32xf32, #tpu.memory_space<vmem>>, vector<8x32xf32>
    %1 = arith.truncf %0 : vector<8x32xf32> to vector<8x32xbf16>
    %c0_1 = arith.constant 0 : index
    %c0_2 = arith.constant 0 : index
    %2 = vector.load %arg2[%c0_1, %c0_2] : memref<32x128xbf16, #tpu.memory_space<vmem>>, vector<32x128xbf16>
    %cst = arith.constant dense<0.000000e+00> : vector<8x128xf32>
    %3 = tpu.matmul %1, %2, %cst {dimension_numbers = #tpu.dot_dimension_numbers<[1], [0], [0], [1], [0, 0, 1, 1], [], []>} : vector<8x32xbf16>, vector<32x128xbf16>, vector<8x128xf32> -> vector<8x128xf32>
    %c0_3 = arith.constant 0 : index
    %c0_4 = arith.constant 0 : index
    %4 = vector.load %arg3[%c0_3, %c0_4] : memref<1x128xf32, #tpu.memory_space<vmem>>, vector<1x128xf32>
    %5 = vector.broadcast %4 : vector<1x128xf32> to vector<8x128xf32>
    %6 = arith.addf %3, %5 : vector<8x128xf32>
    %cst_5 = arith.constant 0.00999999977 : f32
    %7 = vector.broadcast %cst_5 : f32 to vector<8x128xf32>
    %8 = arith.mulf %7, %6 : vector<8x128xf32>
    %9 = arith.maximumf %6, %8 : vector<8x128xf32>
    %c0_6 = arith.constant 0 : index
    %c0_7 = arith.constant 0 : index
    %10 = vector.load %arg4[%c0_6, %c0_7] : memref<1x128xf32, #tpu.memory_space<vmem>>, vector<1x128xf32>
    %11 = vector.broadcast %10 : vector<1x128xf32> to vector<8x128xf32>
    %12 = arith.mulf %9, %11 : vector<8x128xf32>
    %cst_8 = arith.constant dense<0.000000e+00> : vector<8xf32>
    %13 = vector.multi_reduction <add>, %12, %cst_8 [1] : vector<8x128xf32> to vector<8xf32>
    %c0_9 = arith.constant 0 : index
    %14 = memref.load %arg5[%c0_9] : memref<1xf32, #tpu.memory_space<smem>>
    %15 = vector.broadcast %14 : f32 to vector<8xf32>
    %16 = arith.addf %13, %15 : vector<8xf32>
    %17 = vector.shape_cast %16 : vector<8xf32> to vector<1x8xf32>
    %c0_10 = arith.constant 0 : index
    %c0_11 = arith.constant 0 : index
    %18 = vector.load %arg6[%c0_10, %c0_11] : memref<1x8xf32, #tpu.memory_space<vmem>>, vector<1x8xf32>
    tpu.vector_store %arg6[%c0_10, %c0_11], %17 {strides = array<i32>} : memref<1x8xf32, #tpu.memory_space<vmem>>, vector<1x8xf32>,
    return
  }
  func.func @transform_0(%arg0: i32) -> (i32, i32) {
    %c0_i32 = arith.constant 0 : i32
    %c0_i32_0 = arith.constant 0 : i32
    return %arg0, %c0_i32 : i32, i32
  }
  func.func @transform_1(%arg0: i32) -> (i32, i32) {
    %c0_i32 = arith.constant 0 : i32
    %c0_i32_0 = arith.constant 0 : i32
    %c0_i32_1 = arith.constant 0 : i32
    return %c0_i32, %c0_i32_0 : i32, i32
  }
  func.func @transform_2(%arg0: i32) -> (i32, i32) {
    %c0_i32 = arith.constant 0 : i32
    %c0_i32_0 = arith.constant 0 : i32
    %c0_i32_1 = arith.constant 0 : i32
    return %c0_i32, %c0_i32_0 : i32, i32
  }
  func.func @transform_3(%arg0: i32) -> (i32, i32) {
    %c0_i32 = arith.constant 0 : i32
    %c0_i32_0 = arith.constant 0 : i32
    %c0_i32_1 = arith.constant 0 : i32
    return %c0_i32, %c0_i32_0 : i32, i32
  }
  func.func @transform_4(%arg0: i32) -> i32 {
    %c0_i32 = arith.constant 0 : i32
    %c0_i32_0 = arith.constant 0 : i32
    return %c0_i32 : i32
  }
  func.func @transform_5(%arg0: i32) -> (i32, i32) {
    %c0_i32 = arith.constant 0 : i32
    %c0_i32_0 = arith.constant 0 : i32
    return %arg0, %c0_i32 : i32, i32
  }
}

</mosaic_0001>

<bundles_post_ra>
// kernel: tpu_custom_call.1
= control target key start
LH: loop header
LB: loop body
LE: loop exit
PB: predicated region body
PF: predicated region fallthrough
CT: control target
= control target key end

     0   :  { %11 = vsyncpa [#allocation4], 0  ;;  %s345_s0 = inlined_call_operand.hbm [shape: f32[8,32], index: 0, kind: input, shape index: {}]   ;;  %s346_s1 = inlined_call_operand.hbm [shape: bf16[32,128], index: 1, kind: input, shape index: {}]   ;;  %s347_s2 = inlined_call_operand.vmem [shape: f32[1,128], index: 2, kind: input, shape index: {}]   ;;  %s348_s3 = inlined_call_operand.vmem [shape: f32[1,128], index: 3, kind: input, shape index: {}]   ;;  %s349_s4 = inlined_call_operand.<no memory space> [shape: f32[1], index: 4, kind: input, shape index: {}]   ;;  %s350_s5 = inlined_call_operand.hbm [shape: f32[1,8], index: 5, kind: output, shape index: {}]  }
   0x1   :  { %12 = vsyncpa [#allocation7], 0 }
   0x2   :  { %13 = vsyncpa [#allocation5], 0  ;;  %s256_s18 = smov [#allocation3]   ;;  %s257_s20 = smov [#allocation6]  }
   0x3   :  { %s20_s19 = sshll.u32 %s256_s18, 4  ;;  %s29_s21 = sshll.u32 %s257_s20, 4  ;;  %s21_s19 = int_to_ptr.vmem [resolvable:$true] %s20_s19  ;;  %s293_s21 = int_to_ptr.vmem [resolvable:$true] %s29_s21 }
   0x4   :  { %s184_s24 = scalar_lea.hbm %s345_s0, 128 }
   0x5   :  { %p185_p0 = scmp.ne.s32.totalorder %s345_s0, %s184_s24  ;;  %p188_p1 = scmp.lt.u32.totalorder %s184_s24, %s345_s0 }
   0x7   :  { %p190_p2 = pnand %p188_p1, %p185_p0 }
   0x9   :  { %193 = shalt.err (!%p190_p2)
}
   0xa   :  { %s194_s29 = scalar_lea.vmem %s21_s19, 128  ;;  %p199_p4 = scmp.lt.s32.totalorder %s21_s19, %s21_s19 }
   0xb   :  { %p195_p3 = scmp.ne.s32.totalorder %s21_s19, %s194_s29  ;;  %p200_p5 = scmp.lt.s32.totalorder %s194_s29, %s194_s29 }
   0xd   :  { %p201_p6 = por %p200_p5, %p199_p4 }
   0xf   :  { %p202_p7 = pnand %p201_p6, %p195_p3 }
  0x11   :  { %205 = shalt.err (!%p202_p7)
}
  0x12   :  { %23 = dma.hbm_to_vmem [thread:$0]  %s345_s0, 128, %s21_s19, [#allocation4]  }
  0x13   :  { %s206_s9 = scalar_lea.hbm %s346_s1, 256 }
  0x14   :  { %p207_p8 = scmp.ne.s32.totalorder %s346_s1, %s206_s9  ;;  %p210_p9 = scmp.lt.u32.totalorder %s206_s9, %s346_s1 }
  0x16   :  { %p212_p10 = pnand %p210_p9, %p207_p8 }
  0x18   :  { %215 = shalt.err (!%p212_p10)
}
  0x19   :  { %s216_s14 = scalar_lea.vmem %s293_s21, 256  ;;  %p221_p12 = scmp.lt.s32.totalorder %s293_s21, %s293_s21 }
  0x1a   :  { %p217_p11 = scmp.ne.s32.totalorder %s293_s21, %s216_s14  ;;  %p222_p13 = scmp.lt.s32.totalorder %s216_s14, %s216_s14 }
  0x1c   :  { %p223_p0 = por %p222_p13, %p221_p12 }
  0x1e   :  { %p224_p1 = pnand %p223_p0, %p217_p11 }
  0x20   :  { %227 = shalt.err (!%p224_p1)
}
  0x21   :  { %s258_s0 = smov 64   ;;  %s259_s15 = smov 4  }
  0x22   :  { %35 = dma.hbm_to_vmem [thread:$0]  %s346_s1, 256, %s293_s21, [#allocation7], %s258_s0, %s258_s0, %s259_s15  }
  0x23   :  { %250 = dma.done.wait [#allocation4], 128  }
  0x24   :  { %251 = vsyncadd [#allocation4], 4294967168 }
  0x25   :  { %252 = dma.done.wait [#allocation7], 256  }
  0x26   :  { %253 = vsyncadd [#allocation7], 4294967040  ;;  %v260_v0 = vmov 0.0   ;;  %vm261_vm0 = vmmov 0   ;;  %v182_v1 = vld [vmem:[#allocation6] sm:$0xff]   ;;  %v183_v2 = vld [vmem:[#allocation6 + $0x8] sm:$0xff]   ;;  %v134_v15 = vlaneseq  ;;  %v131_v18 = vstv %s349_s4 }
  0x27   :  { %167 = vmatprep.subr.bf16.mxu0 %v260_v0  ;;  %171 = vmatprep.mubr.msk.bf16.mxu0 %vm261_vm0, %v260_v0  ;;  %v49_v3 = vld [vmem:[#allocation3] sm:$0xff]  ;;  %vm74_vm1 = vcmask 261120   ;;  %vm141_vm2 = vcmask 57344  }
  0x28   :  { %168 = vmatpush3.bf16.msra.mxu0 %v182_v1  ;;  %v50_v4 = vpack.c.bf16 %v49_v3, %v49_v3  ;;  %v159_v5 = vld [vmem:[%s347_s2] ss:$0 sm:$0xff]  ;;  %v135_v16 = vand.u32 127, %v134_v15  ;;  %v137_v17 = vshrl.u32 %v134_v15, 7  ;;  %s262_s2 = smov [#allocation8]  }
  0x29   :  { %169 = vmatprep.subr.bf16.mxu0 %v260_v0  ;;  %v163_v12 = vld [vmem:[%s348_s3] ss:$0 sm:$0xff]  ;;  %s149_s23 = sshll.u32 %s262_s2, 4  ;;  %s150_s23 = int_to_ptr.vmem [resolvable:$true] %s149_s23 }
  0x2a   :  { %v138_v19 = vsub.s32 %v135_v16, %v137_v17  ;;  %s228_s3 = scalar_lea.vmem %s150_s23, 16  ;;  %s232_s24 = scalar_lea.vmem %s150_s23, 32 }
  0x2b   :  { %p229_p2 = scmp.ne.s32.totalorder %s150_s23, %s228_s3  ;;  %p233_p3 = scmp.lt.s32.totalorder %s150_s23, %s150_s23 }
  0x2c   :  { %170 = vmatpush3.bf16.msra.mxu0 %v183_v2  ;;  %p234_p4 = scmp.lt.s32.totalorder %s232_s24, %s228_s3 }
  0x2e   :  { %p235_p5 = por %p234_p4, %p233_p3 }
  0x2f   :  { %172 = vmatmul.mubr.msk.bf16.vlgmr.msra.gmra.mrb[0].mxu0 %vm74_vm1, %v50_v4 }
  0x30   :  { %p236_p6 = pnand %p235_p5, %p229_p2 }
 0x102   :  { %v112_v6 = vpop.f32.mrb[0].mxu0 }
 0x103   :  { %v113_v7 = vadd.f32 %v159_v5, %v112_v6  ;;  %v173_v8 = vpop.f32.mrb[1].mxu0 }
 0x104   :  { %v115_v9 = vpop.f32.mrb[2].mxu0 }
 0x105   :  { %v118_v10 = vmul.f32 0.01, %v113_v7  ;;  %v174_v11 = vpop.f32.mrb[3].mxu0 }
 0x107   :  { %v119_v13 = vmax.f32 %v113_v7, %v118_v10 }
 0x109   :  { %v127_v14 = vmul.f32 %v163_v12, %v119_v13 }
 0x10b   :  { %128 = vadd.xlane.f32.xlu0 %v127_v14 }
 0x198   :  { %v129_v20 = vpop.xlane.xlu0 %128 }
 0x199   :  { %v132_v21 = vadd.f32 %v131_v18, %v129_v20 }
 0x19b   :  { %v139_v22 = vrot.slane %v132_v21, %v138_v19 }
 0x19d   :  { %142 = vst.msk [vmem:[#allocation8] sm:$0x1] %vm141_vm2, %v139_v22 }
 0x19e   :  { %239 = shalt.err (!%p236_p6)
}
 0x19f   :  { %s240_s4 = scalar_lea.hbm %s350_s5, 16 }
 0x1a0   :  { %p241_p7 = scmp.ne.s32.totalorder %s350_s5, %s240_s4  ;;  %p244_p8 = scmp.lt.u32.totalorder %s240_s4, %s350_s5 }
 0x1a2   :  { %p246_p9 = pnand %p244_p8, %p241_p7 }
 0x1a4   :  { %249 = shalt.err (!%p246_p9)
}
 0x1a5   :  { %152 = dma.vmem_to_hbm [thread:$0]  %s150_s23, 16, %s350_s5, [#allocation5]  }
 0x1a6   :  { %254 = dma.done.wait [#allocation5], 16  }
 0x1a7   :  { %255 = vsyncadd [#allocation5], 4294967280 }
 0x1a8   :  { %156 = vsyncpa [#allocation4], 1 }
 0x1a9   :  { %157 = vsyncpa [#allocation7], 1 }
 0x1aa   :  { %158 = vsyncpa [#allocation5], 1 }

</bundles_post_ra>
